<compile_context>
chip_gen: v6e
topology: v6e:2x2x1
jax: 0.10.0
libtpu: 0.0.40
codegen_flags: <defaults>
</compile_context>

<pallas_src>
import jax
import jax.numpy as jnp
from jax.experimental import pallas as pl
from jax.experimental.pallas import tpu as pltpu


def residual_linear_kernel(x_ref, w_ref, b_ref, o_ref):
    """One (TM, TN) output tile, accumulated directly in o_ref over K.

    x_ref : (TM, TK) f32   -- matmul lhs block (i, k); also the residual tile
                              when k == j (requires TN == TK).
    w_ref : (TK, TN) bf16  -- weight block (k, j)
    b_ref : (1,  TN) f32   -- bias block (0, j)
    o_ref : (TM, TN) f32   -- output block (i, j); VMEM-resident across K, so
                              it doubles as the f32 accumulator.
    """
    j = pl.program_id(1)
    k = pl.program_id(2)

    @pl.when(k == 0)
    def _init():
        # Start the accumulator with the bias (broadcast over rows); the
        # matmul and the residual are accumulated on top.
        o_ref[...] = jnp.broadcast_to(b_ref[...], o_ref.shape)

    x_f32 = x_ref[...]

    # MXU matmul: bf16 operands (cast in-register), f32 accumulation.
    o_ref[...] += jnp.dot(x_f32.astype(jnp.bfloat16), w_ref[...],
                          preferred_element_type=jnp.float32)

    # Residual: with TN == TK the lhs block at k == j covers exactly this
    # output tile's columns of x, so add it once, in f32 (exact residual).
    @pl.when(k == j)
    def _residual():
        o_ref[...] += x_f32


def _largest_aligned_divisor(dim, cap, align):
    """Largest multiple of `align` dividing `dim` with value <= min(dim, cap).

    Returns None if no such tile exists (caller decides the fallback).
    """
    best = None
    limit = min(dim, cap)
    t = align
    while t <= limit:
        if dim % t == 0:
            best = t
        t += align
    return best


def _round_up(v, mult):
    return (v + mult - 1) // mult * mult


def _tpu_vmem_bytes():
    """Physical VMEM capacity; conservative (v7x per-TC) fallback."""
    try:
        info = pltpu.get_tpu_info()
        cap = getattr(info, "vmem_capacity_bytes", None)
        if cap:
            return int(cap)
    except Exception:
        pass
    return 64 * 1024 * 1024


def _tile_caps():
    """(tm_cap, tn_cap, vmem_limit_bytes) derived per TPU generation."""
    vmem = _tpu_vmem_bytes()
    budget = vmem * 3 // 4
    if vmem >= 96 * 1024 * 1024:
        # v5e / v6e: 128 MiB VMEM.  1536-tiles push v6e toward compute-bound
        # (working set ~47 MiB incl. double buffers, well inside the budget).
        return 1536, 1536, budget
    # v7x: 64 MiB per TensorCore.  ~310 FLOP/byte suffices (3.2 TB/s HBM), so
    # 1024-tiles (~20 MiB working set) reach the roofline without spilling.
    return 1024, 1024, budget


def residual_linear(x, w, b, *, tm=None, tn=None):
    """Residual(Linear): Linear(x) + x, fused in one Pallas kernel.

    x: (batch, seq, hidden) f32
    w: (hidden, hidden) stored as (in, out) so the kernel computes x @ w
    b: (hidden,)
    """
    batch, seq, hidden = x.shape
    m = batch * seq
    x2d = x.reshape(m, hidden)
    if x2d.dtype != jnp.float32:
        x2d = x2d.astype(jnp.float32)

    # Pad M to the f32 sublane multiple so tile selection never needs an odd
    # full-extent block; padded rows are sliced off after the kernel.
    m_pad = _round_up(m, 8)
    if m_pad != m:
        x2d = jnp.pad(x2d, ((0, m_pad - m), (0, 0)))

    tm_cap, tn_cap, vmem_limit = _tile_caps()
    if tm is not None:
        tm_cap = tm
    if tn is not None:
        tn_cap = tn

    # TM: prefer 16-alignment (bf16 sublane pack), then 8 (f32), then full.
    TM = (_largest_aligned_divisor(m_pad, tm_cap, 16)
          or _largest_aligned_divisor(m_pad, tm_cap, 8)
          or m_pad)
    # TN: lane-dense multiple of 128; fall back to the full extent only when
    # hidden has no 128-aligned divisor (valid full-dim block; pad hidden at
    # production shapes to avoid this path).
    TN = _largest_aligned_divisor(hidden, tn_cap, 128) or hidden
    # The residual-from-lhs trick requires TK == TN.
    TK = TN

    # v7x megacore: keep >= 2 blocks on a parallel axis at big shapes so the
    # second TensorCore gets work.
    if m_pad // TM == 1 and hidden // TN == 1 and m_pad >= 256:
        smaller = (_largest_aligned_divisor(m_pad, TM // 2, 16)
                   or _largest_aligned_divisor(m_pad, TM // 2, 8))
        if smaller:
            TM = smaller

    grid = (m_pad // TM, hidden // TN, hidden // TK)

    # Weights in bf16 for the MXU: cast once (amortized over the m/TM
    # re-streams of W); skip the pass entirely if already bf16.
    w_mxu = w if w.dtype == jnp.bfloat16 else w.astype(jnp.bfloat16)
    b2d = b.reshape(1, hidden).astype(jnp.float32)

    out2d = pl.pallas_call(
        residual_linear_kernel,
        out_shape=jax.ShapeDtypeStruct((m_pad, hidden), jnp.float32),
        grid_spec=pltpu.PrefetchScalarGridSpec(
            num_scalar_prefetch=0,
            grid=grid,
            in_specs=[
                pl.BlockSpec((TM, TK), lambda i, j, k: (i, k)),   # x (f32 lhs + residual)
                pl.BlockSpec((TK, TN), lambda i, j, k: (k, j)),   # W (bf16)
                pl.BlockSpec((1, TN), lambda i, j, k: (0, j)),    # bias (f32)
            ],
            out_specs=pl.BlockSpec((TM, TN), lambda i, j, k: (i, j)),
        ),
        compiler_params=pltpu.CompilerParams(
            # M and N blocks are independent -> shard across TensorCores
            # (v7x megacore); K is the reduction axis -> "arbitrary", last.
            dimension_semantics=("parallel", "parallel", "arbitrary"),
            # ~3/4 of this generation's physical VMEM (96 MiB on v5e/v6e,
            # 48 MiB on v7x), sized together with the tile caps above.
            vmem_limit_bytes=int(vmem_limit),
        ),
    )(x2d, w_mxu, b2d)

    if m_pad != m:
        out2d = out2d[:m]
    out2d = out2d.astype(x.dtype)
    return out2d.reshape(batch, seq, hidden)


if __name__ == "__main__":
    # Small but TPU-friendly shape: hidden is a multiple of 128 so the lane
    # axis is dense (unmasked vector stores, full MXU columns).
    batch, seq, hidden = 2, 8, 128

    key = jax.random.PRNGKey(0)
    kx, kw, kb = jax.random.split(key, 3)

    x = jax.random.normal(kx, (batch, seq, hidden), dtype=jnp.float32)
    # Deterministic Linear(hidden, hidden) params (PyTorch fan_in init),
    # stored as (in, out) so the kernel computes x @ w directly.
    bound = 1.0 / (hidden ** 0.5)
    w = jax.random.uniform(kw, (hidden, hidden), dtype=jnp.float32,
                           minval=-bound, maxval=bound)
    b = jax.random.uniform(kb, (hidden,), dtype=jnp.float32,
                           minval=-bound, maxval=bound)

    out = jax.block_until_ready(residual_linear(x, w, b))
    assert out.shape == x.shape

    # Reference with the same mixed precision (bf16 matmul operands, f32
    # accumulation, f32 bias + residual).
    x2d = x.reshape(-1, hidden)
    ref_mixed = (jnp.dot(x2d.astype(jnp.bfloat16), w.astype(jnp.bfloat16),
                         preferred_element_type=jnp.float32)
                 + b + x2d).reshape(batch, seq, hidden)
    assert jnp.allclose(out, ref_mixed, atol=1e-3, rtol=1e-3), \
        "mismatch vs mixed-precision reference"

    # Sanity check against the pure-f32 Residual(Linear) semantics (loose
    # tolerance: bf16 matmul error grows with hidden).
    ref_f32 = jnp.einsum("bsh,ho->bso", x, w) + b + x
    assert jnp.allclose(out, ref_f32, atol=5e-2, rtol=5e-2), \
        "mismatch vs f32 reference"

    print("KERNEL_OK")
</pallas_src>

<mosaic_0001>
module attributes {stable_mosaic.version = 11 : i64} {
  func.func @residual_linear_kernel(%arg0: i32, %arg1: i32, %arg2: i32, %arg3: memref<16x128xf32, #tpu.memory_space<vmem>>, %arg4: memref<128x128xbf16, #tpu.memory_space<vmem>>, %arg5: memref<1x128xf32, #tpu.memory_space<vmem>>, %arg6: memref<16x128xf32, #tpu.memory_space<vmem>>) attributes {dimension_semantics = [#tpu.dimension_semantics<parallel>, #tpu.dimension_semantics<parallel>, #tpu.dimension_semantics<arbitrary>], iteration_bounds = array<i64: 1, 1, 1>, scalar_prefetch = 0 : i64, scratch_operands = 0 : i64, tpu.core_type = #tpu.core_type<tc>, window_params = [{transform_indices = @transform_0, window_bounds = array<i64: 16, 128>}, {transform_indices = @transform_1, window_bounds = array<i64: 128, 128>}, {transform_indices = @transform_2, window_bounds = array<i64: 1, 128>}, {transform_indices = @transform_3, window_bounds = array<i64: 16, 128>}]} {
    %c0_i32 = arith.constant 0 : i32
    %0 = arith.cmpi eq, %arg2, %c0_i32 : i32
    %1 = arith.extui %0 : i1 to i32
    %c0_i32_0 = arith.constant 0 : i32
    %2 = arith.cmpi ne, %1, %c0_i32_0 : i32
    scf.if %2 {
      %c0_9 = arith.constant 0 : index
      %c0_10 = arith.constant 0 : index
      %13 = vector.load %arg5[%c0_9, %c0_10] : memref<1x128xf32, #tpu.memory_space<vmem>>, vector<1x128xf32>
      %14 = vector.shape_cast %13 : vector<1x128xf32> to vector<1x128xf32>
      %15 = vector.broadcast %14 : vector<1x128xf32> to vector<16x128xf32>
      %c0_11 = arith.constant 0 : index
      %c0_12 = arith.constant 0 : index
      %16 = vector.load %arg6[%c0_11, %c0_12] : memref<16x128xf32, #tpu.memory_space<vmem>>, vector<16x128xf32>
      tpu.vector_store %arg6[%c0_11, %c0_12], %15 {strides = array<i32>} : memref<16x128xf32, #tpu.memory_space<vmem>>, vector<16x128xf32>,
    } else {
    }
    %c0 = arith.constant 0 : index
    %c0_1 = arith.constant 0 : index
    %3 = vector.load %arg3[%c0, %c0_1] : memref<16x128xf32, #tpu.memory_space<vmem>>, vector<16x128xf32>
    %c0_2 = arith.constant 0 : index
    %c0_3 = arith.constant 0 : index
    %4 = vector.load %arg6[%c0_2, %c0_3] : memref<16x128xf32, #tpu.memory_space<vmem>>, vector<16x128xf32>
    %5 = arith.truncf %3 : vector<16x128xf32> to vector<16x128xbf16>
    %c0_4 = arith.constant 0 : index
    %c0_5 = arith.constant 0 : index
    %6 = vector.load %arg4[%c0_4, %c0_5] : memref<128x128xbf16, #tpu.memory_space<vmem>>, vector<128x128xbf16>
    %cst = arith.constant dense<0.000000e+00> : vector<16x128xf32>
    %7 = tpu.matmul %5, %6, %cst {dimension_numbers = #tpu.dot_dimension_numbers<[1], [0], [0], [1], [0, 0, 1, 1], [], []>} : vector<16x128xbf16>, vector<128x128xbf16>, vector<16x128xf32> -> vector<16x128xf32>
    %8 = arith.addf %4, %7 : vector<16x128xf32>
    %c0_6 = arith.constant 0 : index
    %c0_7 = arith.constant 0 : index
    %9 = vector.load %arg6[%c0_6, %c0_7] : memref<16x128xf32, #tpu.memory_space<vmem>>, vector<16x128xf32>
    tpu.vector_store %arg6[%c0_6, %c0_7], %8 {strides = array<i32>} : memref<16x128xf32, #tpu.memory_space<vmem>>, vector<16x128xf32>,
    %10 = arith.cmpi eq, %arg2, %arg1 : i32
    %11 = arith.extui %10 : i1 to i32
    %c0_i32_8 = arith.constant 0 : i32
    %12 = arith.cmpi ne, %11, %c0_i32_8 : i32
    scf.if %12 {
      %c0_9 = arith.constant 0 : index
      %c0_10 = arith.constant 0 : index
      %13 = vector.load %arg6[%c0_9, %c0_10] : memref<16x128xf32, #tpu.memory_space<vmem>>, vector<16x128xf32>
      %14 = arith.addf %13, %3 : vector<16x128xf32>
      %c0_11 = arith.constant 0 : index
      %c0_12 = arith.constant 0 : index
      %15 = vector.load %arg6[%c0_11, %c0_12] : memref<16x128xf32, #tpu.memory_space<vmem>>, vector<16x128xf32>
      tpu.vector_store %arg6[%c0_11, %c0_12], %14 {strides = array<i32>} : memref<16x128xf32, #tpu.memory_space<vmem>>, vector<16x128xf32>,
    } else {
    }
    return
  }
  func.func @transform_0(%arg0: i32, %arg1: i32, %arg2: i32) -> (i32, i32) {
    %c0_i32 = arith.constant 0 : i32
    return %arg0, %arg2 : i32, i32
  }
  func.func @transform_1(%arg0: i32, %arg1: i32, %arg2: i32) -> (i32, i32) {
    %c0_i32 = arith.constant 0 : i32
    return %arg2, %arg1 : i32, i32
  }
  func.func @transform_2(%arg0: i32, %arg1: i32, %arg2: i32) -> (i32, i32) {
    %c0_i32 = arith.constant 0 : i32
    %c0_i32_0 = arith.constant 0 : i32
    return %c0_i32, %arg1 : i32, i32
  }
  func.func @transform_3(%arg0: i32, %arg1: i32, %arg2: i32) -> (i32, i32) {
    %c0_i32 = arith.constant 0 : i32
    return %arg0, %arg1 : i32, i32
  }
}

</mosaic_0001>

<bundles_post_ra>
// kernel: tpu_custom_call.1
= control target key start
LH: loop header
LB: loop body
LE: loop exit
PB: predicated region body
PF: predicated region fallthrough
CT: control target
= control target key end

     0   :  { %8 = vsyncpa [#allocation3], 0  ;;  %s367_s0 = inlined_call_operand.hbm [shape: f32[16,128], index: 0, kind: input, shape index: {}]   ;;  %s368_s1 = inlined_call_operand.hbm [shape: bf16[128,128], index: 1, kind: input, shape index: {}]   ;;  %s369_s2 = inlined_call_operand.vmem [shape: f32[1,128], index: 2, kind: input, shape index: {}]   ;;  %s370_s3 = inlined_call_operand.hbm [shape: f32[16,128], index: 3, kind: output, shape index: {}]  }
   0x1   :  { %9 = vsyncpa [#allocation6], 0 }
   0x2   :  { %10 = vsyncpa [#allocation4], 0  ;;  %s320_s12 = smov [#allocation2]  }
   0x3   :  { %s16_s13 = sshll.u32 %s320_s12, 4  ;;  %s17_s13 = int_to_ptr.vmem [resolvable:$true] %s16_s13 }
   0x4   :  { %s262_s14 = scalar_lea.vmem %s17_s13, 256  ;;  %p267_p1 = scmp.lt.s32.totalorder %s17_s13, %s17_s13 }
   0x5   :  { %p263_p0 = scmp.ne.s32.totalorder %s17_s13, %s262_s14  ;;  %p268_p2 = scmp.lt.s32.totalorder %s262_s14, %s262_s14 }
   0x7   :  { %p269_p3 = por %p268_p2, %p267_p1 }
   0x9   :  { %p270_p4 = pnand %p269_p3, %p263_p0 }
   0xb   :  { %273 = shalt.err (!%p270_p4)
}
   0xc   :  { %s321_s15 = smov 128   ;;  %s322_s16 = smov 8  }
   0xd   :  { %22 = dma.hbm_to_vmem [thread:$0]  %s367_s0, 256, %s17_s13, [#allocation3], %s321_s15, %s321_s15, %s322_s16  }
   0xe   :  { %s323_s19 = smov [#allocation5]  }
   0xf   :  { %s28_s20 = sshll.u32 %s323_s19, 4  ;;  %s29_s20 = int_to_ptr.vmem [resolvable:$true] %s28_s20 }
  0x10   :  { %s282_s21 = scalar_lea.vmem %s29_s20, 1024  ;;  %p287_p6 = scmp.lt.s32.totalorder %s29_s20, %s29_s20 }
  0x11   :  { %p283_p5 = scmp.ne.s32.totalorder %s29_s20, %s282_s21  ;;  %p288_p7 = scmp.lt.s32.totalorder %s282_s21, %s282_s21 }
  0x13   :  { %p289_p8 = por %p288_p7, %p287_p6 }
  0x15   :  { %p290_p9 = pnand %p289_p8, %p283_p5 }
  0x17   :  { %293 = shalt.err (!%p290_p9)
}
  0x18   :  { %s324_s22 = smov 64   ;;  %s325_s23 = smov 4  }
  0x19   :  { %34 = dma.hbm_to_vmem [thread:$0]  %s368_s1, 1024, %s29_s20, [#allocation6], %s324_s22, %s324_s22, %s325_s23  }
  0x1a   :  { %314 = dma.done.wait [#allocation3], 256  }
  0x1b   :  { %315 = vsyncadd [#allocation3], 4294967040 }
  0x1c   :  { %316 = dma.done.wait [#allocation6], 1024  }
  0x1d   :  { %317 = vsyncadd [#allocation6], 4294966272  ;;  %v326_v0 = vmov 0.0   ;;  %vm327_vm0 = vmmov 0   ;;  %v246_v1 = vld [vmem:[#allocation5 + $0x38] sm:$0xff]   ;;  %v247_v2 = vld [vmem:[#allocation5 + $0x30] sm:$0xff]  }
  0x1e   :  { %217 = vmatprep.subr.bf16.mxu0 %v326_v0  ;;  %233 = vmatprep.mubr.msk.bf16.mxu0 %vm327_vm0, %v326_v0  ;;  %v248_v3 = vld [vmem:[#allocation5 + $0x28] sm:$0xff]   ;;  %v249_v4 = vld [vmem:[#allocation5 + $0x20] sm:$0xff]   ;;  %v250_v5 = vld [vmem:[#allocation5 + $0x18] sm:$0xff]   ;;  %s328_s26 = smov [#allocation7]  }
  0x1f   :  { %218 = vmatpush3.bf16.msra.mxu0 %v246_v1  ;;  %v251_v6 = vld [vmem:[#allocation5 + $0x10] sm:$0xff]   ;;  %v252_v7 = vld [vmem:[#allocation5 + $0x8] sm:$0xff]   ;;  %v253_v8 = vld [vmem:[#allocation5] sm:$0xff]   ;;  %s186_s27 = sshll.u32 %s328_s26, 4  ;;  %s187_s27 = int_to_ptr.vmem [resolvable:$true] %s186_s27 }
  0x20   :  { %219 = vmatprep.subr.bf16.mxu0 %v326_v0  ;;  %v57_v9 = vld [vmem:[#allocation2] sm:$0xff]  ;;  %v58_v10 = vld [vmem:[#allocation2 + $0x8] sm:$0xff]  ;;  %s294_s28 = scalar_lea.vmem %s187_s27, 256  ;;  %p299_p11 = scmp.lt.s32.totalorder %s187_s27, %s187_s27 }
  0x21   :  { %v61_v11 = vpack.c.bf16 %v58_v10, %v57_v9  ;;  %v199_v12 = vld [vmem:[%s369_s2] ss:$0 sm:$0xff]  ;;  %p295_p10 = scmp.ne.s32.totalorder %s187_s27, %s294_s28  ;;  %p300_p12 = scmp.lt.s32.totalorder %s294_s28, %s294_s28 }
  0x23   :  { %220 = vmatpush3.bf16.msra.mxu0 %v247_v2  ;;  %p301_p13 = por %p300_p12, %p299_p11 }
  0x24   :  { %221 = vmatprep.subr.bf16.mxu0 %v326_v0 }
  0x25   :  { %p302_p0 = pnand %p301_p13, %p295_p10 }
  0x27   :  { %222 = vmatpush3.bf16.msra.mxu0 %v248_v3 }
  0x28   :  { %223 = vmatprep.subr.bf16.mxu0 %v326_v0 }
  0x2b   :  { %224 = vmatpush3.bf16.msra.mxu0 %v249_v4 }
  0x2c   :  { %225 = vmatprep.subr.bf16.mxu0 %v326_v0 }
  0x2f   :  { %226 = vmatpush3.bf16.msra.mxu0 %v250_v5 }
  0x30   :  { %227 = vmatprep.subr.bf16.mxu0 %v326_v0 }
  0x33   :  { %228 = vmatpush3.bf16.msra.mxu0 %v251_v6 }
  0x34   :  { %229 = vmatprep.subr.bf16.mxu0 %v326_v0 }
  0x37   :  { %230 = vmatpush3.bf16.msra.mxu0 %v252_v7 }
  0x38   :  { %231 = vmatprep.subr.bf16.mxu0 %v326_v0 }
  0x3b   :  { %232 = vmatpush3.bf16.msra.mxu0 %v253_v8 }
  0x3e   :  { %234 = vmatmul.mubr.bf16.vlgmr.msra.gmra.mxu0 %v61_v11 }
  0xfe   :  { %v160_v13 = vpop.f32.mrf.mxu0 }
  0xff   :  { %v167_v14 = vadd.f32 %v199_v12, %v160_v13 }
 0x100   :  { %v235_v15 = vpop.f32.mrf.mxu0 }
 0x101   :  { %v177_v16 = vadd.f32 %v167_v14, %v57_v9 }
 0x102   :  { %v163_v17 = vpop.f32.mrf.mxu0 }
 0x103   :  { %v168_v18 = vadd.f32 %v199_v12, %v163_v17  ;;  %179 = vst [vmem:[#allocation7] sm:$0xff] %v177_v16 }
 0x104   :  { %v236_v19 = vpop.f32.mrf.mxu0 }
 0x105   :  { %v178_v20 = vadd.f32 %v168_v18, %v58_v10 }
 0x107   :  { %180 = vst [vmem:[#allocation7 + $0x8] sm:$0xff] %v178_v20 }
 0x108   :  { %305 = shalt.err (!%p302_p0)
}
 0x109   :  { %192 = dma.vmem_to_hbm [thread:$0]  %s187_s27, 256, %s370_s3, [#allocation4], %s321_s15, %s321_s15, %s322_s16  }
 0x10a   :  { %318 = dma.done.wait [#allocation4], 256  }
 0x10b   :  { %319 = vsyncadd [#allocation4], 4294967040 }
 0x10c   :  { %196 = vsyncpa [#allocation3], 1 }
 0x10d   :  { %197 = vsyncpa [#allocation6], 1 }
 0x10e   :  { %198 = vsyncpa [#allocation4], 1 }

</bundles_post_ra>
